<compile_context>
chip_gen: v5e
topology: v5e:2x2
jax: 0.10.0
libtpu: 0.0.40
codegen_flags: <defaults>
</compile_context>

<pallas_src>
import functools

import jax
import jax.numpy as jnp
from jax.experimental import pallas as pl
from jax.experimental.pallas import tpu as pltpu


def _attention_kernel(x_ref, wqkv_ref, wproj_ref, bproj_ref, o_ref, *,
                      num_heads, head_dim, exp_dtype):
    x = x_ref[0].astype(jnp.bfloat16)          # (L, D) activations
    wqkv = wqkv_ref[...]                       # (D, 3D) bf16, scale folded into Q cols
    wproj = wproj_ref[...]                     # (D, D)  bf16
    bproj = bproj_ref[...]                     # (1, D)  f32

    L, D = x.shape
    H, Dh = num_heads, head_dim

    # Fused QKV projection (no bias): bf16 operands, f32 MXU accumulation.
    qkv = jnp.dot(x, wqkv, preferred_element_type=jnp.float32)      # (L, 3D) f32

    def split_heads(cols):                     # (L, D) f32 -> (H, L, Dh) bf16
        # Per-head static lane slices + leading-axis stack: the minimal
        # relayout (one lane shift per head), no 3-D reshape/transpose.
        cols = cols.astype(jnp.bfloat16)
        return jnp.stack([cols[:, h * Dh:(h + 1) * Dh] for h in range(H)],
                         axis=0)

    q = split_heads(qkv[:, :D])                # scale already folded into wqkv
    k = split_heads(qkv[:, D:2 * D])
    v = split_heads(qkv[:, 2 * D:])

    # Scores batched over the leading head axis (no k.T materialization).
    s = jnp.einsum('hqd,hkd->hqk', q, k,
                   preferred_element_type=jnp.float32)              # (H, L, L) f32
    m = jnp.max(s, axis=-1, keepdims=True)                          # f32 max-subtract
    p = jnp.exp((s - m).astype(exp_dtype))                          # unnormalized probs
    l = jnp.sum(p.astype(jnp.float32), axis=-1, keepdims=True)      # f32 row sums

    pv = jnp.einsum('hqk,hkd->hqd', p.astype(jnp.bfloat16), v,
                    preferred_element_type=jnp.float32)             # (H, L, Dh) f32
    # Deferred normalization on the small (H, L, Dh) tensor; EUP approx recip.
    attn = (pv * pl.reciprocal(l, approx=True)).astype(jnp.bfloat16)

    # Merge heads with a lane concatenation back to (L, D); the output
    # projection then contracts at full depth D on the MXU.
    merged = jnp.concatenate([attn[h] for h in range(H)], axis=-1)  # (L, D) bf16
    out = jnp.dot(merged, wproj, preferred_element_type=jnp.float32) + bproj
    o_ref[0] = out.astype(o_ref.dtype)


def _softmax_exp_dtype():
    """bf16 exp on chips with a bf16 EUP (v6e / v7x); f32 elsewhere (v5e, v4)."""
    try:
        kind = jax.devices()[0].device_kind.lower()
    except Exception:
        return jnp.float32
    if any(tag in kind for tag in ("v6", "v7", "tpu7", "7x")):
        return jnp.bfloat16
    return jnp.float32


def _vmem_limit_bytes(L, D, num_heads, single_buffered_weights):
    """Footprint-based scoped-VMEM request, capped at 75% of physical VMEM."""
    f32, bf16 = 4, 2
    H = num_heads
    dh_pad = max(D // H, 128)                  # per-head lane padding
    l_sub = ((L + 7) // 8) * 8                 # sublane padding
    l_lane = max(((L + 127) // 128) * 128, 128)
    wbuf = 1 if single_buffered_weights else 2
    io = 2 * 2 * (L * D * f32)                               # x + out blocks (double buffered)
    weights = wbuf * ((3 * D * D + D * D) * bf16 + D * f32)
    interm = (3 * L * D * f32                                # qkv accumulator
              + 3 * H * l_sub * dh_pad * bf16                # q, k, v head stacks
              + 2 * H * l_sub * l_lane * f32                 # scores + exp (f32 worst case)
              + H * l_sub * dh_pad * f32                     # PV accumulator
              + L * D * (bf16 + f32))                        # merged heads + out
    est = int(1.5 * (io + weights + interm))                 # compiler-scratch headroom
    try:
        cap = int(0.75 * pltpu.get_tpu_info().vmem_capacity_bytes)
    except Exception:
        cap = 48 * 1024 * 1024                               # safe even on v7x (64 MiB phys)
    return min(max(est, 32 * 1024 * 1024), cap)


def _build_attention_call(B, L, D, num_heads, out_dtype, exp_dtype,
                          single_buffered_weights):
    kernel = functools.partial(_attention_kernel, num_heads=num_heads,
                               head_dim=D // num_heads, exp_dtype=exp_dtype)

    def weight_spec(shape):
        # Grid-invariant weights: constant block index; request a single
        # pipeline buffer so they are not needlessly double buffered.
        kwargs = {"pipeline_mode": pl.Buffered(1)} if single_buffered_weights else {}
        return pl.BlockSpec(shape, lambda b: (0, 0), **kwargs)

    return pl.pallas_call(
        kernel,
        out_shape=jax.ShapeDtypeStruct((B, L, D), out_dtype),
        grid_spec=pltpu.PrefetchScalarGridSpec(
            num_scalar_prefetch=0,
            grid=(B,),
            in_specs=[
                pl.BlockSpec((1, L, D), lambda b: (b, 0, 0)),
                weight_spec((D, 3 * D)),
                weight_spec((D, D)),
                weight_spec((1, D)),
            ],
            out_specs=pl.BlockSpec((1, L, D), lambda b: (b, 0, 0)),
        ),
        compiler_params=pltpu.CompilerParams(
            dimension_semantics=("parallel",),
            vmem_limit_bytes=_vmem_limit_bytes(L, D, num_heads,
                                               single_buffered_weights)),
    )


def attention_forward(x, wqkv_t, wproj_t, bproj, num_heads,
                      out_dtype=jnp.float32):
    """x: (B, L, D) f32 or bf16; wqkv_t: (D, 3D); wproj_t: (D, D); bproj: (D,).

    On bandwidth-limited chips (v5e) pass x already cast to bf16 by the
    producing layer and set out_dtype=jnp.bfloat16 to halve activation DMA;
    accumulation and softmax statistics stay in f32 either way.
    """
    B, L, D = x.shape
    head_dim = D // num_heads
    scale = head_dim ** (-0.5)

    # Host-side one-time weight prep: fold the softmax scale into the Q
    # columns before the bf16 cast (mirrors the module's autocast matmuls and
    # halves weight HBM->VMEM traffic / resident footprint).
    wqkv_scaled = wqkv_t.astype(jnp.float32).at[:, :D].multiply(scale)
    wqkv_bf = wqkv_scaled.astype(jnp.bfloat16)
    wproj_bf = wproj_t.astype(jnp.bfloat16)
    bproj2d = bproj.reshape(1, D).astype(jnp.float32)

    exp_dtype = _softmax_exp_dtype()

    last_err = None
    # Prefer single-buffered grid-invariant weights; fall back to the default
    # double buffering if this JAX/Mosaic build rejects pl.Buffered(1).
    for single_buffered in (True, False):
        try:
            fn = _build_attention_call(B, L, D, num_heads, out_dtype, exp_dtype,
                                       single_buffered)
            out = fn(x, wqkv_bf, wproj_bf, bproj2d)
            return jax.block_until_ready(out)
        except Exception as err:      # capability fallback only
            last_err = err
    raise last_err


def attention_reference(x, wqkv_t, wproj_t, bproj, num_heads):
    """Pure-JAX f32 reference mirroring the PyTorch module's forward."""
    B, L, D = x.shape
    head_dim = D // num_heads
    scale = head_dim ** (-0.5)
    qkv = x @ wqkv_t                                   # (B, L, 3D)
    qkv = qkv.reshape(B, L, 3, num_heads, head_dim).transpose(2, 0, 3, 1, 4)
    q, k, v = qkv[0], qkv[1], qkv[2]                   # (B, H, L, Dh)
    scores = jnp.einsum('bhqd,bhkd->bhqk', q, k) * scale
    p = jax.nn.softmax(scores, axis=-1)
    attn = jnp.einsum('bhqk,bhkd->bhqd', p, v)         # (B, H, L, Dh)
    attn = attn.transpose(2, 0, 1, 3).reshape(L, B, D).transpose(1, 0, 2)
    return attn @ wproj_t + bproj


if __name__ == "__main__":
    B, L, D, H = 2, 8, 32, 4

    key = jax.random.PRNGKey(0)
    kx, kqkv, kproj, kb = jax.random.split(key, 4)

    x = jax.random.normal(kx, (B, L, D), dtype=jnp.float32)
    # nn.Linear weights are (out, in); pass transposed (in, out) views.
    wqkv = jax.random.normal(kqkv, (3 * D, D), dtype=jnp.float32) * 0.05
    wproj = jax.random.normal(kproj, (D, D), dtype=jnp.float32) * 0.05
    bproj = jax.random.normal(kb, (D,), dtype=jnp.float32) * 0.05

    out = attention_forward(x, wqkv.T, wproj.T, bproj, num_heads=H)
    out = jax.block_until_ready(out)

    ref = attention_reference(x, wqkv.T, wproj.T, bproj, num_heads=H)
    assert out.shape == ref.shape
    # bf16 matmul operands (matching the module's autocast) + approx recip
    # in the softmax denominator -> relaxed tolerance.
    assert jnp.allclose(out, ref, atol=2e-2, rtol=2e-2), "mismatch vs reference"

    print("KERNEL_OK")
</pallas_src>

<mosaic_0001>
module attributes {stable_mosaic.version = 11 : i64} {
  func.func @_attention_kernel(%arg0: i32, %arg1: memref<1x8x32xf32, #tpu.memory_space<vmem>>, %arg2: memref<32x96xbf16, #tpu.memory_space<vmem>>, %arg3: memref<32x32xbf16, #tpu.memory_space<vmem>>, %arg4: memref<1x32xf32, #tpu.memory_space<vmem>>, %arg5: memref<1x8x32xf32, #tpu.memory_space<vmem>>) attributes {dimension_semantics = [#tpu.dimension_semantics<parallel>], iteration_bounds = array<i64: 2>, scalar_prefetch = 0 : i64, scratch_operands = 0 : i64, tpu.core_type = #tpu.core_type<tc>, window_params = [{transform_indices = @transform_0, window_bounds = array<i64: 1, 8, 32>}, {pipeline_mode = #tpu.pipeline_mode<synchronous>, transform_indices = @transform_1, window_bounds = array<i64: 32, 96>}, {pipeline_mode = #tpu.pipeline_mode<synchronous>, transform_indices = @transform_2, window_bounds = array<i64: 32, 32>}, {pipeline_mode = #tpu.pipeline_mode<synchronous>, transform_indices = @transform_3, window_bounds = array<i64: 1, 32>}, {transform_indices = @transform_4, window_bounds = array<i64: 1, 8, 32>}]} {
    %c0 = arith.constant 0 : index
    %c0_0 = arith.constant 0 : index
    %c0_1 = arith.constant 0 : index
    %0 = vector.load %arg1[%c0, %c0_0, %c0_1] : memref<1x8x32xf32, #tpu.memory_space<vmem>>, vector<1x8x32xf32>
    %1 = vector.shape_cast %0 : vector<1x8x32xf32> to vector<8x32xf32>
    %2 = arith.truncf %1 : vector<8x32xf32> to vector<8x32xbf16>
    %c0_2 = arith.constant 0 : index
    %c0_3 = arith.constant 0 : index
    %3 = vector.load %arg2[%c0_2, %c0_3] : memref<32x96xbf16, #tpu.memory_space<vmem>>, vector<32x96xbf16>
    %c0_4 = arith.constant 0 : index
    %c0_5 = arith.constant 0 : index
    %4 = vector.load %arg3[%c0_4, %c0_5] : memref<32x32xbf16, #tpu.memory_space<vmem>>, vector<32x32xbf16>
    %c0_6 = arith.constant 0 : index
    %c0_7 = arith.constant 0 : index
    %5 = vector.load %arg4[%c0_6, %c0_7] : memref<1x32xf32, #tpu.memory_space<vmem>>, vector<1x32xf32>
    %cst = arith.constant dense<0.000000e+00> : vector<8x96xf32>
    %6 = tpu.matmul %2, %3, %cst {dimension_numbers = #tpu.dot_dimension_numbers<[1], [0], [0], [1], [0, 0, 1, 1], [], []>} : vector<8x32xbf16>, vector<32x96xbf16>, vector<8x96xf32> -> vector<8x96xf32>
    %7 = vector.extract_strided_slice %6 {offsets = [0, 0], sizes = [8, 32], strides = [1, 1]} : vector<8x96xf32> to vector<8x32xf32>
    %8 = arith.truncf %7 : vector<8x32xf32> to vector<8x32xbf16>
    %9 = vector.extract_strided_slice %8 {offsets = [0, 0], sizes = [8, 8], strides = [1, 1]} : vector<8x32xbf16> to vector<8x8xbf16>
    %10 = vector.extract_strided_slice %8 {offsets = [0, 8], sizes = [8, 8], strides = [1, 1]} : vector<8x32xbf16> to vector<8x8xbf16>
    %11 = vector.extract_strided_slice %8 {offsets = [0, 16], sizes = [8, 8], strides = [1, 1]} : vector<8x32xbf16> to vector<8x8xbf16>
    %12 = vector.extract_strided_slice %8 {offsets = [0, 24], sizes = [8, 8], strides = [1, 1]} : vector<8x32xbf16> to vector<8x8xbf16>
    %13 = vector.shape_cast %9 : vector<8x8xbf16> to vector<1x8x8xbf16>
    %14 = vector.shape_cast %10 : vector<8x8xbf16> to vector<1x8x8xbf16>
    %15 = vector.shape_cast %11 : vector<8x8xbf16> to vector<1x8x8xbf16>
    %16 = vector.shape_cast %12 : vector<8x8xbf16> to vector<1x8x8xbf16>
    %17 = tpu.concatenate %13, %14, %15, %16 in 0 : vector<1x8x8xbf16>, vector<1x8x8xbf16>, vector<1x8x8xbf16>, vector<1x8x8xbf16> -> vector<4x8x8xbf16>
    %18 = vector.extract_strided_slice %6 {offsets = [0, 32], sizes = [8, 32], strides = [1, 1]} : vector<8x96xf32> to vector<8x32xf32>
    %19 = arith.truncf %18 : vector<8x32xf32> to vector<8x32xbf16>
    %20 = vector.extract_strided_slice %19 {offsets = [0, 0], sizes = [8, 8], strides = [1, 1]} : vector<8x32xbf16> to vector<8x8xbf16>
    %21 = vector.extract_strided_slice %19 {offsets = [0, 8], sizes = [8, 8], strides = [1, 1]} : vector<8x32xbf16> to vector<8x8xbf16>
    %22 = vector.extract_strided_slice %19 {offsets = [0, 16], sizes = [8, 8], strides = [1, 1]} : vector<8x32xbf16> to vector<8x8xbf16>
    %23 = vector.extract_strided_slice %19 {offsets = [0, 24], sizes = [8, 8], strides = [1, 1]} : vector<8x32xbf16> to vector<8x8xbf16>
    %24 = vector.shape_cast %20 : vector<8x8xbf16> to vector<1x8x8xbf16>
    %25 = vector.shape_cast %21 : vector<8x8xbf16> to vector<1x8x8xbf16>
    %26 = vector.shape_cast %22 : vector<8x8xbf16> to vector<1x8x8xbf16>
    %27 = vector.shape_cast %23 : vector<8x8xbf16> to vector<1x8x8xbf16>
    %28 = tpu.concatenate %24, %25, %26, %27 in 0 : vector<1x8x8xbf16>, vector<1x8x8xbf16>, vector<1x8x8xbf16>, vector<1x8x8xbf16> -> vector<4x8x8xbf16>
    %29 = vector.extract_strided_slice %6 {offsets = [0, 64], sizes = [8, 32], strides = [1, 1]} : vector<8x96xf32> to vector<8x32xf32>
    %30 = arith.truncf %29 : vector<8x32xf32> to vector<8x32xbf16>
    %31 = vector.extract_strided_slice %30 {offsets = [0, 0], sizes = [8, 8], strides = [1, 1]} : vector<8x32xbf16> to vector<8x8xbf16>
    %32 = vector.extract_strided_slice %30 {offsets = [0, 8], sizes = [8, 8], strides = [1, 1]} : vector<8x32xbf16> to vector<8x8xbf16>
    %33 = vector.extract_strided_slice %30 {offsets = [0, 16], sizes = [8, 8], strides = [1, 1]} : vector<8x32xbf16> to vector<8x8xbf16>
    %34 = vector.extract_strided_slice %30 {offsets = [0, 24], sizes = [8, 8], strides = [1, 1]} : vector<8x32xbf16> to vector<8x8xbf16>
    %35 = vector.shape_cast %31 : vector<8x8xbf16> to vector<1x8x8xbf16>
    %36 = vector.shape_cast %32 : vector<8x8xbf16> to vector<1x8x8xbf16>
    %37 = vector.shape_cast %33 : vector<8x8xbf16> to vector<1x8x8xbf16>
    %38 = vector.shape_cast %34 : vector<8x8xbf16> to vector<1x8x8xbf16>
    %39 = tpu.concatenate %35, %36, %37, %38 in 0 : vector<1x8x8xbf16>, vector<1x8x8xbf16>, vector<1x8x8xbf16>, vector<1x8x8xbf16> -> vector<4x8x8xbf16>
    "tpu.trace_start"() <{level = 10 : i32, message = "hqd,hkd->hqk"}> : () -> ()
    %cst_8 = arith.constant dense<0.000000e+00> : vector<4x8x8xf32>
    %40 = tpu.matmul %17, %28, %cst_8 {dimension_numbers = #tpu.dot_dimension_numbers<[2], [2], [1], [1], [0, 0, 0, 1, 1, 1], [0], [0]>} : vector<4x8x8xbf16>, vector<4x8x8xbf16>, vector<4x8x8xf32> -> vector<4x8x8xf32>
    "tpu.trace_stop"() : () -> ()
    %cst_9 = arith.constant dense<0xFF800000> : vector<4x8xf32>
    %41 = vector.multi_reduction <maximumf>, %40, %cst_9 [2] : vector<4x8x8xf32> to vector<4x8xf32>
    %42 = vector.shape_cast %41 : vector<4x8xf32> to vector<4x8x1xf32>
    %43 = vector.broadcast %42 : vector<4x8x1xf32> to vector<4x8x8xf32>
    %44 = arith.subf %40, %43 : vector<4x8x8xf32>
    %45 = math.exp %44 : vector<4x8x8xf32>
    %cst_10 = arith.constant dense<0.000000e+00> : vector<4x8xf32>
    %46 = vector.multi_reduction <add>, %45, %cst_10 [2] : vector<4x8x8xf32> to vector<4x8xf32>
    %47 = vector.shape_cast %46 : vector<4x8xf32> to vector<4x8x1xf32>
    %48 = arith.truncf %45 : vector<4x8x8xf32> to vector<4x8x8xbf16>
    "tpu.trace_start"() <{level = 10 : i32, message = "hqk,hkd->hqd"}> : () -> ()
    %cst_11 = arith.constant dense<0.000000e+00> : vector<4x8x8xf32>
    %49 = tpu.matmul %48, %39, %cst_11 {dimension_numbers = #tpu.dot_dimension_numbers<[2], [1], [1], [2], [0, 0, 0, 1, 1, 2], [0], [0]>} : vector<4x8x8xbf16>, vector<4x8x8xbf16>, vector<4x8x8xf32> -> vector<4x8x8xf32>
    "tpu.trace_stop"() : () -> ()
    %50 = tpu.reciprocal %47 {approx = true} : vector<4x8x1xf32> -> vector<4x8x1xf32>
    %51 = vector.broadcast %50 : vector<4x8x1xf32> to vector<4x8x8xf32>
    %52 = arith.mulf %49, %51 : vector<4x8x8xf32>
    %53 = arith.truncf %52 : vector<4x8x8xf32> to vector<4x8x8xbf16>
    %54 = vector.extract_strided_slice %53 {offsets = [0, 0, 0], sizes = [1, 8, 8], strides = [1, 1, 1]} : vector<4x8x8xbf16> to vector<1x8x8xbf16>
    %55 = vector.shape_cast %54 : vector<1x8x8xbf16> to vector<8x8xbf16>
    %56 = vector.extract_strided_slice %53 {offsets = [1, 0, 0], sizes = [1, 8, 8], strides = [1, 1, 1]} : vector<4x8x8xbf16> to vector<1x8x8xbf16>
    %57 = vector.shape_cast %56 : vector<1x8x8xbf16> to vector<8x8xbf16>
    %58 = vector.extract_strided_slice %53 {offsets = [2, 0, 0], sizes = [1, 8, 8], strides = [1, 1, 1]} : vector<4x8x8xbf16> to vector<1x8x8xbf16>
    %59 = vector.shape_cast %58 : vector<1x8x8xbf16> to vector<8x8xbf16>
    %60 = vector.extract_strided_slice %53 {offsets = [3, 0, 0], sizes = [1, 8, 8], strides = [1, 1, 1]} : vector<4x8x8xbf16> to vector<1x8x8xbf16>
    %61 = vector.shape_cast %60 : vector<1x8x8xbf16> to vector<8x8xbf16>
    %62 = tpu.concatenate %55, %57, %59, %61 in 1 : vector<8x8xbf16>, vector<8x8xbf16>, vector<8x8xbf16>, vector<8x8xbf16> -> vector<8x32xbf16>
    %cst_12 = arith.constant dense<0.000000e+00> : vector<8x32xf32>
    %63 = tpu.matmul %62, %4, %cst_12 {dimension_numbers = #tpu.dot_dimension_numbers<[1], [0], [0], [1], [0, 0, 1, 1], [], []>} : vector<8x32xbf16>, vector<32x32xbf16>, vector<8x32xf32> -> vector<8x32xf32>
    %64 = vector.broadcast %5 : vector<1x32xf32> to vector<8x32xf32>
    %65 = arith.addf %63, %64 : vector<8x32xf32>
    %c0_13 = arith.constant 0 : index
    %c0_14 = arith.constant 0 : index
    %c0_15 = arith.constant 0 : index
    %66 = vector.load %arg5[%c0_13, %c0_14, %c0_15] : memref<1x8x32xf32, #tpu.memory_space<vmem>>, vector<1x8x32xf32>
    %67 = vector.shape_cast %66 : vector<1x8x32xf32> to vector<8x32xf32>
    %68 = vector.shape_cast %65 : vector<8x32xf32> to vector<1x8x32xf32>
    tpu.vector_store %arg5[%c0_13, %c0_14, %c0_15], %68 {strides = array<i32>} : memref<1x8x32xf32, #tpu.memory_space<vmem>>, vector<1x8x32xf32>,
    return
  }
  func.func @transform_0(%arg0: i32) -> (i32, i32, i32) {
    %c0_i32 = arith.constant 0 : i32
    %c0_i32_0 = arith.constant 0 : i32
    %c0_i32_1 = arith.constant 0 : i32
    return %arg0, %c0_i32, %c0_i32_0 : i32, i32, i32
  }
  func.func @transform_1(%arg0: i32) -> (i32, i32) {
    %c0_i32 = arith.constant 0 : i32
    %c0_i32_0 = arith.constant 0 : i32
    %c0_i32_1 = arith.constant 0 : i32
    return %c0_i32, %c0_i32_0 : i32, i32
  }
  func.func @transform_2(%arg0: i32) -> (i32, i32) {
    %c0_i32 = arith.constant 0 : i32
    %c0_i32_0 = arith.constant 0 : i32
    %c0_i32_1 = arith.constant 0 : i32
    return %c0_i32, %c0_i32_0 : i32, i32
  }
  func.func @transform_3(%arg0: i32) -> (i32, i32) {
    %c0_i32 = arith.constant 0 : i32
    %c0_i32_0 = arith.constant 0 : i32
    %c0_i32_1 = arith.constant 0 : i32
    return %c0_i32, %c0_i32_0 : i32, i32
  }
  func.func @transform_4(%arg0: i32) -> (i32, i32, i32) {
    %c0_i32 = arith.constant 0 : i32
    %c0_i32_0 = arith.constant 0 : i32
    %c0_i32_1 = arith.constant 0 : i32
    return %arg0, %c0_i32, %c0_i32_0 : i32, i32, i32
  }
}

module attributes {stable_mosaic.version = 11 : i64} {
  func.func @_attention_kernel(%arg0: i32, %arg1: memref<1x8x32xf32, #tpu.memory_space<vmem>>, %arg2: memref<32x96xbf16, #tpu.memory_space<vmem>>, %arg3: memref<32x32xbf16, #tpu.memory_space<vmem>>, %arg4: memref<1x32xf32, #tpu.memory_space<vmem>>, %arg5: memref<1x8x32xf32, #tpu.memory_space<vmem>>) attributes {dimension_semantics = [#tpu.dimension_semantics<parallel>], iteration_bounds = array<i64: 2>, scalar_prefetch = 0 : i64, scratch_operands = 0 : i64, tpu.core_type = #tpu.core_type<tc>, window_params = [{transform_indices = @transform_0, window_bounds = array<i64: 1, 8, 32>}, {pipeline_mode = #tpu.pipeline_mode<synchronous>, transform_indices = @transform_1, window_bounds = array<i64: 32, 96>}, {pipeline_mode = #tpu.pipeline_mode<synchronous>, transform_indices = @transform_2, window_bounds = array<i64: 32, 32>}, {pipeline_mode = #tpu.pipeline_mode<synchronous>, transform_indices = @transform_3, window_bounds = array<i64: 1, 32>}, {transform_indices = @transform_4, window_bounds = array<i64: 1, 8, 32>}]} {
    %c0 = arith.constant 0 : index
    %c0_0 = arith.constant 0 : index
    %c0_1 = arith.constant 0 : index
    %0 = vector.load %arg1[%c0, %c0_0, %c0_1] : memref<1x8x32xf32, #tpu.memory_space<vmem>>, vector<1x8x32xf32>
    %1 = vector.shape_cast %0 : vector<1x8x32xf32> to vector<8x32xf32>
    %2 = arith.truncf %1 : vector<8x32xf32> to vector<8x32xbf16>
    %c0_2 = arith.constant 0 : index
    %c0_3 = arith.constant 0 : index
    %3 = vector.load %arg2[%c0_2, %c0_3] : memref<32x96xbf16, #tpu.memory_space<vmem>>, vector<32x96xbf16>
    %c0_4 = arith.constant 0 : index
    %c0_5 = arith.constant 0 : index
    %4 = vector.load %arg3[%c0_4, %c0_5] : memref<32x32xbf16, #tpu.memory_space<vmem>>, vector<32x32xbf16>
    %c0_6 = arith.constant 0 : index
    %c0_7 = arith.constant 0 : index
    %5 = vector.load %arg4[%c0_6, %c0_7] : memref<1x32xf32, #tpu.memory_space<vmem>>, vector<1x32xf32>
    %cst = arith.constant dense<0.000000e+00> : vector<8x96xf32>
    %6 = tpu.matmul %2, %3, %cst {dimension_numbers = #tpu.dot_dimension_numbers<[1], [0], [0], [1], [0, 0, 1, 1], [], []>} : vector<8x32xbf16>, vector<32x96xbf16>, vector<8x96xf32> -> vector<8x96xf32>
    %7 = vector.extract_strided_slice %6 {offsets = [0, 0], sizes = [8, 32], strides = [1, 1]} : vector<8x96xf32> to vector<8x32xf32>
    %8 = arith.truncf %7 : vector<8x32xf32> to vector<8x32xbf16>
    %9 = vector.extract_strided_slice %8 {offsets = [0, 0], sizes = [8, 8], strides = [1, 1]} : vector<8x32xbf16> to vector<8x8xbf16>
    %10 = vector.extract_strided_slice %8 {offsets = [0, 8], sizes = [8, 8], strides = [1, 1]} : vector<8x32xbf16> to vector<8x8xbf16>
    %11 = vector.extract_strided_slice %8 {offsets = [0, 16], sizes = [8, 8], strides = [1, 1]} : vector<8x32xbf16> to vector<8x8xbf16>
    %12 = vector.extract_strided_slice %8 {offsets = [0, 24], sizes = [8, 8], strides = [1, 1]} : vector<8x32xbf16> to vector<8x8xbf16>
    %13 = vector.shape_cast %9 : vector<8x8xbf16> to vector<1x8x8xbf16>
    %14 = vector.shape_cast %10 : vector<8x8xbf16> to vector<1x8x8xbf16>
    %15 = vector.shape_cast %11 : vector<8x8xbf16> to vector<1x8x8xbf16>
    %16 = vector.shape_cast %12 : vector<8x8xbf16> to vector<1x8x8xbf16>
    %17 = tpu.concatenate %13, %14, %15, %16 in 0 : vector<1x8x8xbf16>, vector<1x8x8xbf16>, vector<1x8x8xbf16>, vector<1x8x8xbf16> -> vector<4x8x8xbf16>
    %18 = vector.extract_strided_slice %6 {offsets = [0, 32], sizes = [8, 32], strides = [1, 1]} : vector<8x96xf32> to vector<8x32xf32>
    %19 = arith.truncf %18 : vector<8x32xf32> to vector<8x32xbf16>
    %20 = vector.extract_strided_slice %19 {offsets = [0, 0], sizes = [8, 8], strides = [1, 1]} : vector<8x32xbf16> to vector<8x8xbf16>
    %21 = vector.extract_strided_slice %19 {offsets = [0, 8], sizes = [8, 8], strides = [1, 1]} : vector<8x32xbf16> to vector<8x8xbf16>
    %22 = vector.extract_strided_slice %19 {offsets = [0, 16], sizes = [8, 8], strides = [1, 1]} : vector<8x32xbf16> to vector<8x8xbf16>
    %23 = vector.extract_strided_slice %19 {offsets = [0, 24], sizes = [8, 8], strides = [1, 1]} : vector<8x32xbf16> to vector<8x8xbf16>
    %24 = vector.shape_cast %20 : vector<8x8xbf16> to vector<1x8x8xbf16>
    %25 = vector.shape_cast %21 : vector<8x8xbf16> to vector<1x8x8xbf16>
    %26 = vector.shape_cast %22 : vector<8x8xbf16> to vector<1x8x8xbf16>
    %27 = vector.shape_cast %23 : vector<8x8xbf16> to vector<1x8x8xbf16>
    %28 = tpu.concatenate %24, %25, %26, %27 in 0 : vector<1x8x8xbf16>, vector<1x8x8xbf16>, vector<1x8x8xbf16>, vector<1x8x8xbf16> -> vector<4x8x8xbf16>
    %29 = vector.extract_strided_slice %6 {offsets = [0, 64], sizes = [8, 32], strides = [1, 1]} : vector<8x96xf32> to vector<8x32xf32>
    %30 = arith.truncf %29 : vector<8x32xf32> to vector<8x32xbf16>
    %31 = vector.extract_strided_slice %30 {offsets = [0, 0], sizes = [8, 8], strides = [1, 1]} : vector<8x32xbf16> to vector<8x8xbf16>
    %32 = vector.extract_strided_slice %30 {offsets = [0, 8], sizes = [8, 8], strides = [1, 1]} : vector<8x32xbf16> to vector<8x8xbf16>
    %33 = vector.extract_strided_slice %30 {offsets = [0, 16], sizes = [8, 8], strides = [1, 1]} : vector<8x32xbf16> to vector<8x8xbf16>
    %34 = vector.extract_strided_slice %30 {offsets = [0, 24], sizes = [8, 8], strides = [1, 1]} : vector<8x32xbf16> to vector<8x8xbf16>
    %35 = vector.shape_cast %31 : vector<8x8xbf16> to vector<1x8x8xbf16>
    %36 = vector.shape_cast %32 : vector<8x8xbf16> to vector<1x8x8xbf16>
    %37 = vector.shape_cast %33 : vector<8x8xbf16> to vector<1x8x8xbf16>
    %38 = vector.shape_cast %34 : vector<8x8xbf16> to vector<1x8x8xbf16>
    %39 = tpu.concatenate %35, %36, %37, %38 in 0 : vector<1x8x8xbf16>, vector<1x8x8xbf16>, vector<1x8x8xbf16>, vector<1x8x8xbf16> -> vector<4x8x8xbf16>
    "tpu.trace_start"() <{level = 10 : i32, message = "hqd,hkd->hqk"}> : () -> ()
    %cst_8 = arith.constant dense<0.000000e+00> : vector<4x8x8xf32>
    %40 = tpu.matmul %17, %28, %cst_8 {dimension_numbers = #tpu.dot_dimension_numbers<[2], [2], [1], [1], [0, 0, 0, 1, 1, 1], [0], [0]>} : vector<4x8x8xbf16>, vector<4x8x8xbf16>, vector<4x8x8xf32> -> vector<4x8x8xf32>
    "tpu.trace_stop"() : () -> ()
    %cst_9 = arith.constant dense<0xFF800000> : vector<4x8xf32>
    %41 = vector.multi_reduction <maximumf>, %40, %cst_9 [2] : vector<4x8x8xf32> to vector<4x8xf32>
    %42 = vector.shape_cast %41 : vector<4x8xf32> to vector<4x8x1xf32>
    %43 = vector.broadcast %42 : vector<4x8x1xf32> to vector<4x8x8xf32>
    %44 = arith.subf %40, %43 : vector<4x8x8xf32>
    %45 = math.exp %44 : vector<4x8x8xf32>
    %cst_10 = arith.constant dense<0.000000e+00> : vector<4x8xf32>
    %46 = vector.multi_reduction <add>, %45, %cst_10 [2] : vector<4x8x8xf32> to vector<4x8xf32>
    %47 = vector.shape_cast %46 : vector<4x8xf32> to vector<4x8x1xf32>
    %48 = arith.truncf %45 : vector<4x8x8xf32> to vector<4x8x8xbf16>
    "tpu.trace_start"() <{level = 10 : i32, message = "hqk,hkd->hqd"}> : () -> ()
    %cst_11 = arith.constant dense<0.000000e+00> : vector<4x8x8xf32>
    %49 = tpu.matmul %48, %39, %cst_11 {dimension_numbers = #tpu.dot_dimension_numbers<[2], [1], [1], [2], [0, 0, 0, 1, 1, 2], [0], [0]>} : vector<4x8x8xbf16>, vector<4x8x8xbf16>, vector<4x8x8xf32> -> vector<4x8x8xf32>
    "tpu.trace_stop"() : () -> ()
    %50 = tpu.reciprocal %47 {approx = true} : vector<4x8x1xf32> -> vector<4x8x1xf32>
    %51 = vector.broadcast %50 : vector<4x8x1xf32> to vector<4x8x8xf32>
    %52 = arith.mulf %49, %51 : vector<4x8x8xf32>
    %53 = arith.truncf %52 : vector<4x8x8xf32> to vector<4x8x8xbf16>
    %54 = vector.extract_strided_slice %53 {offsets = [0, 0, 0], sizes = [1, 8, 8], strides = [1, 1, 1]} : vector<4x8x8xbf16> to vector<1x8x8xbf16>
    %55 = vector.shape_cast %54 : vector<1x8x8xbf16> to vector<8x8xbf16>
    %56 = vector.extract_strided_slice %53 {offsets = [1, 0, 0], sizes = [1, 8, 8], strides = [1, 1, 1]} : vector<4x8x8xbf16> to vector<1x8x8xbf16>
    %57 = vector.shape_cast %56 : vector<1x8x8xbf16> to vector<8x8xbf16>
    %58 = vector.extract_strided_slice %53 {offsets = [2, 0, 0], sizes = [1, 8, 8], strides = [1, 1, 1]} : vector<4x8x8xbf16> to vector<1x8x8xbf16>
    %59 = vector.shape_cast %58 : vector<1x8x8xbf16> to vector<8x8xbf16>
    %60 = vector.extract_strided_slice %53 {offsets = [3, 0, 0], sizes = [1, 8, 8], strides = [1, 1, 1]} : vector<4x8x8xbf16> to vector<1x8x8xbf16>
    %61 = vector.shape_cast %60 : vector<1x8x8xbf16> to vector<8x8xbf16>
    %62 = tpu.concatenate %55, %57, %59, %61 in 1 : vector<8x8xbf16>, vector<8x8xbf16>, vector<8x8xbf16>, vector<8x8xbf16> -> vector<8x32xbf16>
    %cst_12 = arith.constant dense<0.000000e+00> : vector<8x32xf32>
    %63 = tpu.matmul %62, %4, %cst_12 {dimension_numbers = #tpu.dot_dimension_numbers<[1], [0], [0], [1], [0, 0, 1, 1], [], []>} : vector<8x32xbf16>, vector<32x32xbf16>, vector<8x32xf32> -> vector<8x32xf32>
    %64 = vector.broadcast %5 : vector<1x32xf32> to vector<8x32xf32>
    %65 = arith.addf %63, %64 : vector<8x32xf32>
    %c0_13 = arith.constant 0 : index
    %c0_14 = arith.constant 0 : index
    %c0_15 = arith.constant 0 : index
    %66 = vector.load %arg5[%c0_13, %c0_14, %c0_15] : memref<1x8x32xf32, #tpu.memory_space<vmem>>, vector<1x8x32xf32>
    %67 = vector.shape_cast %66 : vector<1x8x32xf32> to vector<8x32xf32>
    %68 = vector.shape_cast %65 : vector<8x32xf32> to vector<1x8x32xf32>
    tpu.vector_store %arg5[%c0_13, %c0_14, %c0_15], %68 {strides = array<i32>} : memref<1x8x32xf32, #tpu.memory_space<vmem>>, vector<1x8x32xf32>,
    return
  }
  func.func @transform_0(%arg0: i32) -> (i32, i32, i32) {
    %c0_i32 = arith.constant 0 : i32
    %c0_i32_0 = arith.constant 0 : i32
    %c0_i32_1 = arith.constant 0 : i32
    return %arg0, %c0_i32, %c0_i32_0 : i32, i32, i32
  }
  func.func @transform_1(%arg0: i32) -> (i32, i32) {
    %c0_i32 = arith.constant 0 : i32
    %c0_i32_0 = arith.constant 0 : i32
    %c0_i32_1 = arith.constant 0 : i32
    return %c0_i32, %c0_i32_0 : i32, i32
  }
  func.func @transform_2(%arg0: i32) -> (i32, i32) {
    %c0_i32 = arith.constant 0 : i32
    %c0_i32_0 = arith.constant 0 : i32
    %c0_i32_1 = arith.constant 0 : i32
    return %c0_i32, %c0_i32_0 : i32, i32
  }
  func.func @transform_3(%arg0: i32) -> (i32, i32) {
    %c0_i32 = arith.constant 0 : i32
    %c0_i32_0 = arith.constant 0 : i32
    %c0_i32_1 = arith.constant 0 : i32
    return %c0_i32, %c0_i32_0 : i32, i32
  }
  func.func @transform_4(%arg0: i32) -> (i32, i32, i32) {
    %c0_i32 = arith.constant 0 : i32
    %c0_i32_0 = arith.constant 0 : i32
    %c0_i32_1 = arith.constant 0 : i32
    return %arg0, %c0_i32, %c0_i32_0 : i32, i32, i32
  }
}

</mosaic_0001>

<bundles_post_ra>
// kernel: tpu_custom_call.1
= control target key start
LH: loop header
LB: loop body
LE: loop exit
PB: predicated region body
PF: predicated region fallthrough
CT: control target
= control target key end

     0   :  { %9 = vsyncpa [#allocation3], 0  ;;  %s1210_s0 = inlined_call_operand.hbm [shape: f32[2,8,32], index: 0, kind: input, shape index: {}]   ;;  %s1211_s1 = inlined_call_operand.hbm [shape: bf16[32,96], index: 1, kind: input, shape index: {}]   ;;  %s1212_s2 = inlined_call_operand.hbm [shape: bf16[32,32], index: 2, kind: input, shape index: {}]   ;;  %s1213_s3 = inlined_call_operand.vmem [shape: f32[1,32], index: 3, kind: input, shape index: {}]   ;;  %s1214_s4 = inlined_call_operand.hbm [shape: f32[2,8,32], index: 4, kind: output, shape index: {}]  }
   0x1   :  { %11 = vsyncpa [#allocation3 + $0x1], 0 }
   0x2   :  { %12 = vsyncpa [#allocation6], 0 }
   0x3   :  { %13 = vsyncpa [#allocation4], 0 }
   0x4   :  { %15 = vsyncpa [#allocation4 + $0x1], 0  ;;  %s1026_s15 = smov 0   ;;  %s1028_s16 = smov 0  }
   0x5   :  { %s1030_s17 = smov 0   ;;  %s1032_s18 = smov 0  }
   0x6 LB: > { %s152_s21 = sshll.u32 %s1211_s1, 4  ;;  %s1050_s22 = sadd.s32 4294967295, %s987_s18   ;;  %s987_s18 = sphi %s1032_s18, %s1225_s18   ;;  %s983_s17 = sphi %s1030_s17, %s1224_s17   ;;  %s979_s16 = sphi %s1028_s16, %s1223_s16   ;;  %s975_s15 = sphi %s1026_s15, %s1222_s15   ;;  %s153_s21 = int_to_ptr.hbm [resolvable:$true] %s152_s21 }
   0x7   : > { %p688_p0 = scmp.ge.s32.totalorder %s987_s18, 1  ;;  %p42_p1 = scmp.eq.s32.totalorder %s1050_s22, 0 }
   0x8   : > { %p141_p2 = scmp.lt.s32.totalorder %s987_s18, 3  ;;  %s989_s24 = smov [#allocation5]  }
   0x9   : > { %s154_s25 = sshll.u32 %s989_s24, 4  ;;  %s166_s28 = sshll.u32 %s1212_s2, 4  ;;  %s155_s25 = int_to_ptr.vmem [resolvable:$true] %s154_s25  ;;  %s167_s28 = int_to_ptr.hbm [resolvable:$true] %s166_s28 }
   0xa   : > { %p1055_p3 = pnand %p688_p0, %p141_p2  ;;  %s990_s29 = smov [#allocation7]  }
   0xb   : > { %s168_s30 = sshll.u32 %s990_s29, 4  ;;  %s991_s5 = smov 64   ;;  %s169_s30 = int_to_ptr.vmem [resolvable:$true] %s168_s30 }
   0xc   : > { %p745_p4 = pneg %p1055_p3  ;;  %s992_s6 = smov 4  }
   0xd   : > { %s687_s7 = sadd.s32 4294967294, %s987_s18   ;;  %s1069_s8 = sadd.s32 1, %s987_s18  }
   0xe   : > { %p746_p6 = pnand %p745_p4, %p42_p1  ;;  %s25_s9 = ssub.s32 %s987_s18, %s1069_s8 }
   0xf   : > { %s28_s10 = sadd.s32 1, %s983_s17  ;;  %p26_p7 = scmp.eq.s32.totalorder %s25_s9, 0 }
  0x10   : > { %748 = dma.hbm_to_vmem [thread:$0]  (!%p746_p6), %s153_s21, 256, %s155_s25, [#allocation6], %s991_s5, %s991_s5, %s992_s6  }
  0x11   : > { %751 = dma.hbm_to_vmem [thread:$0]  (!%p746_p6), %s167_s28, 256, %s169_s30, [#allocation6], %s991_s5, %s991_s5, %s992_s6  }
  0x12   : > { %p35_p8 = scmp.ne.s32.totalorder %s983_s17, %s979_s16  ;;  %p36_p9 = scmp.eq.s32.totalorder %s987_s18, 0 }
  0x13   : > { %p41_p10 = scmp.ne.s32.totalorder %s979_s16, %s975_s15  ;;  %p128_p13 = scmp.eq.s32.totalorder %s1050_s22, 1 }
  0x14   : > { %s1080_s11 = scalar_select %p26_p7, %s983_s17, %s28_s10  }
  0x15   : > { %p1082_p11 = por %p36_p9, %p35_p8  ;;  %p1088_p12 = por %p42_p1, %p41_p10 }
  0x16   : > { %p134_p0 = scmp.eq.s32.totalorder %s687_s7, 1  ;;  %p762_p2 = scmp.lt.s32.totalorder %s987_s18, 2 }
  0x17   : > { %s185_s14 = sand.u32 1, %s983_s17   ;;  %p1095_p4 = por %p128_p13, %p35_p8 }
  0x18   : > { %p1099_p6 = por %p134_p0, %p41_p10  ;;  %s692_s21 = sshll.u32 %s185_s14, 3 }
  0x19   : > { %s693_s24 = sshll.u32 %s987_s18, 3  ;;  %s189_s28 = scalar_lea.vmem [#allocation2], %s692_s21 }
  0x1a   : > { %s193_s27 = scalar_lea.hbm %s1210_s0, %s693_s24  ;;  %s197_s29 = sshll.u32 %s189_s28, 4  ;;  %s198_s29 = int_to_ptr.vmem [resolvable:$true] %s197_s29 }
  0x1b   : > { %s195_s30 = sshll.u32 %s193_s27, 4  ;;  %p1109_p7 = pnand %p762_p2, %p1082_p11  ;;  %s196_s30 = int_to_ptr.hbm [resolvable:$true] %s195_s30 }
  0x1c   : > { %s186_s6 = scalar_lea.sflag [#allocation3], %s185_s14  ;;  %s887_s7 = sshra.s32 %s196_s30, 4  ;;  %s888_s7 = int_to_ptr.hbm [resolvable:$true] %s887_s7 }
  0x1d   : > { %s889_s9 = scalar_lea.hbm %s888_s7, 8  ;;  %p891_p9 = pneg %p1109_p7 }
  0x1e   : > { %p890_p8 = scmp.ne.s32.totalorder %s888_s7, %s889_s9  ;;  %s894_s24 = scalar_lea.hbm %s1210_s0, 16 }
  0x1f   : > { %p895_p11 = scmp.lt.s32.totalorder %s888_s7, %s1210_s0  ;;  %p896_p0 = scmp.lt.s32.totalorder %s894_s24, %s889_s9 }
  0x20   : > { %p892_p10 = pnand %p891_p9, %p890_p8 }
  0x21   : > { %p897_p2 = por %p896_p0, %p895_p11 }
  0x22   : > { %p893_p13 = pneg %p892_p10 }
  0x24   : > { %p898_p5 = pnand %p897_p2, %p893_p13 }
  0x26   : > { %901 = shalt.err (!%p898_p5)
}
  0x27   : > { %755 = dma.hbm_to_vmem [thread:$0]  (!%p1109_p7), %s196_s30, 128, %s198_s29, %s186_s6  }
  0x28   : > { %206 = sbr.rel (%p1055_p3) target bundleno = 1094 (0x446), region = 36  ;;  %s1126_s14 = sand.u32 (!%p1055_p3), 1, %s979_s16  }
  0x29   : > { %s695_s26 = sshll.u32 (!%p1055_p3), %s1126_s14, 3  ;;  %s209_s27 = scalar_lea.sflag (!%p1055_p3), [#allocation3], %s1126_s14 }
  0x2a   : > { %s212_s28 = scalar_lea.vmem (!%p1055_p3), [#allocation2], %s695_s26 }
  0x2d   : > { %962 = dma.done.wait (%p1088_p12), %s209_s27, 128  }
  0x2e   : > { %964 = vsyncadd (%p1088_p12), %s209_s27, 4294967168 }
  0x2f   : > { %966 = dma.done.wait (%p42_p1), [#allocation6], 512  }
  0x30   : > { %968 = vsyncadd (%p42_p1), [#allocation6], 4294966784  ;;  %v730_v0 = vld [vmem:[#allocation5 + $0x8] sm:$0xff]  ;;  %v729_v1 = vld [vmem:[#allocation5] sm:$0xff]  ;;  %vm272_vm0 = vcmask 261120   ;;  %s993_s23 = smov 104  }
  0x31   : > { %282 = vmatpush.bf16.msra.mxu0 %v730_v0  ;;  %v249_v2 = vld [vmem:[%s212_s28] sm:$0xff]  ;;  %s994_s13 = smov 120   ;;  %s995_s29 = smov 112   ;;  %vm301_vm1 = vcmask 64512   ;;  %vm435_vm2 = vcmask 1043456   ;;  %vm545_vm3 = vcmask 130048  }
  0x32   : > { %v250_v3 = vpack.c.bf16 %v249_v2, %v249_v2  ;;  %s996_s30 = smov 96   ;;  %s997_s5 = smov 64   ;;  %vm548_vm4 = vcmask 195584  }
  0x33   : > { %s998_s6 = smov 24   ;;  %s999_s7 = smov 8  }
  0x34   : > { %s1000_s9 = smov 16   ;;  %s726_s10 = sshll.u32 %s1050_s22, 3 }
  0x35   : > { %283 = vmatpush.bf16.msra.mxu0 %v729_v1  ;;  %s593_s25 = scalar_lea.hbm %s1214_s4, %s726_s10  ;;  %s247_s28 = scalar_lea.vmem [#allocation8], %s695_s26 }
  0x36   : > { %s583_s22 = scalar_lea.sflag [#allocation4], %s1126_s14  ;;  %s937_s26 = scalar_lea.hbm %s1214_s4, 16 }
  0x38   : > { %707 = vmatmul.msk.bf16.vlgmr.msra.gmra.mxu0 %vm272_vm0, %v250_v3 }
  0xb5   : > { %v285_v4 = vpop.f32.mrf.mxu0 }
  0xb6   : > { %v289_v5 = vpack.c.bf16 %v285_v4, %v285_v4 }
  0xb8   : > { %295 = vrot.lane.b32.xlu1 %v289_v5, %s993_s23  ;;  %291 = vrot.lane.b32.xlu0 %v289_v5, %s994_s13  ;;  %v297_v7 = vunpack.c.l.b16 %v289_v5  ;;  %s595_s23 = sshll.u32 %s247_s28, 4  ;;  %s597_s13 = sshll.u32 %s593_s25, 4  ;;  %s596_s23 = int_to_ptr.vmem [resolvable:$true] %s595_s23  ;;  %s598_s13 = int_to_ptr.hbm [resolvable:$true] %s597_s13 }
  0xba   : > { %v298_v8 = vpack.c.b16 %v297_v7, %v297_v7 }
  0xbd   : > { %v287_v6 = vpop.f32.mrf.mxu0 }
  0xc0   : > { %293 = vrot.lane.b32.xlu0 %v289_v5, %s995_s29  ;;  %s931_s29 = sshra.s32 %s598_s13, 4  ;;  %s932_s29 = int_to_ptr.hbm [resolvable:$true] %s931_s29 }
  0xc1   : > { %p938_p12 = scmp.lt.s32.totalorder %s932_s29, %s1214_s4 }
  0xc8   : > { %299 = vrot.lane.b32.xlu0 %v298_v8, %s996_s30 }
 0x12a   : > { %v292_v9 = vpop.permute.xlu0 %291  ;;  %v296_v15 = vpop.permute.xlu1 %295 }
 0x12b   : > { %v321_v10 = vunpack.c.l.b16 %v292_v9  ;;  %v367_v16 = vunpack.c.l.b16 %v296_v15 }
 0x12d   : > { %v322_v11 = vpack.c.b16 %v321_v10, %v321_v10  ;;  %v368_v19 = vpack.c.b16 %v367_v16, %v367_v16 }
 0x12f   : > { %323 = vrot.lane.b32.xlu1 %v322_v11, %s996_s30 }
 0x132   : > { %v294_v12 = vpop.permute.xlu0 %293 }
 0x133   : > { %v344_v13 = vunpack.c.l.b16 %v294_v12 }
 0x135   : > { %v345_v14 = vpack.c.b16 %v344_v13, %v344_v13 }
 0x137   : > { %346 = vrot.lane.b32.xlu2 %v345_v14, %s996_s30 }
 0x13a   : > { %v300_v17 = vpop.permute.xlu0 %299 }
 0x13b   : > { %v306_v18 = vsel %vm301_vm1, %v300_v17, 0 }
 0x13c   : > { %315 = vmatpush.bf16.xpose.msra.mxu1 %v306_v18 }
 0x13f   : > { %369 = vrot.lane.b32.xlu2 %v368_v19, %s996_s30  ;;  %s933_s30 = scalar_lea.hbm %s932_s29, 8 }
 0x140   : > { %p934_p1 = scmp.ne.s32.totalorder %s932_s29, %s933_s30  ;;  %p939_p7 = scmp.lt.s32.totalorder %s937_s26, %s933_s30 }
 0x142   : > { %p935_p3 = pnand %p934_p1, %p1095_p4  ;;  %p940_p8 = por %p939_p7, %p938_p12 }
 0x143   : > { %708 = vmatmul.msk.bf16.vlgmr.msra.gmra.mxu1 %vm301_vm1, %v289_v5 }
 0x144   : > { %p936_p5 = pneg %p935_p3 }
 0x146   : > { %p941_p9 = pnand %p940_p8, %p936_p5 }
 0x191   : > { %v347_v20 = vpop.permute.xlu2 %346 }
 0x192   : > { %v352_v21 = vsel %vm301_vm1, %v347_v20, 0 }
 0x193   : > { %361 = vmatpush.bf16.xpose.msra.mxu3 %v352_v21 }
 0x199   : > { %v370_v22 = vpop.permute.xlu2 %369 }
 0x19a   : > { %710 = vmatmul.msk.bf16.vlgmr.msra.gmra.mxu3 %vm301_vm1, %v294_v12  ;;  %v375_v23 = vsel %vm301_vm1, %v370_v22, 0 }
 0x19b   : > { %384 = vmatpush.bf16.xpose.msrb.mxu0 %v375_v23 }
 0x1a1   : > { %v324_v24 = vpop.permute.xlu1 %323 }
 0x1a2   : > { %711 = vmatmul.msk.bf16.vlgmr.msrb.gmra.mxu0 %vm301_vm1, %v296_v15  ;;  %v329_v25 = vsel %vm301_vm1, %v324_v24, 0 }
 0x1a3   : > { %338 = vmatpush.bf16.xpose.msra.mxu2 %v329_v25 }
 0x1aa   : > { %709 = vmatmul.msk.bf16.vlgmr.msra.gmra.mxu2 %vm301_vm1, %v292_v9 }
 0x1c0   : > { %v1149_v26 = vpop.f32.mrf.mxu1 }
 0x1c1   : > { %v390_v37 = vsel %vm301_vm1, %v1149_v26, -inf }
 0x1c8   : > { %v319_v27 = vpop.f32.mrf.mxu1 }
 0x21d   : > { %v363_v28 = vpop.f32.mrf.mxu3 }
 0x21e   : > { %v396_v29 = vsel %vm301_vm1, %v363_v28, -inf }
 0x21f   : > { %397 = vmax.xlane.f32.xlu2 %v396_v29  ;;  %v386_v30 = vpop.f32.mrf.mxu0 }
 0x220   : > { %v399_v31 = vsel %vm301_vm1, %v386_v30, -inf }
 0x221   : > { %400 = vmax.xlane.f32.xlu0 %v399_v31 }
 0x225   : > { %v365_v32 = vpop.f32.mrf.mxu3 }
 0x226   : > { %v732_v32 = vld [vmem:[#allocation7 + $0x8] sm:$0xff] }
 0x227   : > { %v388_v33 = vpop.f32.mrf.mxu0 }
 0x228   : > { %v731_v33 = vld [vmem:[#allocation7] sm:$0xff] }
 0x22d   : > { %v340_v34 = vpop.f32.mrf.mxu2 }
 0x22e   : > { %v393_v35 = vsel %vm301_vm1, %v340_v34, -inf }
 0x22f   : > { %394 = vmax.xlane.f32.xlu1 %v393_v35 }
 0x235   : > { %v342_v36 = vpop.f32.mrf.mxu2  ;;  %494 = vrot.lane.b32.xlu0 %v368_v19, %s997_s5 }
 0x237   : > { %452 = vrot.lane.b32.xlu2 %v322_v11, %s997_s5 }
 0x248   : > { %473 = vrot.lane.b32.xlu1 %v345_v14, %s997_s5 }
 0x250   : > { %430 = vrot.lane.b32.xlu1 %v298_v8, %s997_s5 }
 0x260   : > { %391 = vmax.xlane.f32.xlu2 %v390_v37 }
 0x292   : > { %v398_v38 = vpop.xlane.xlu2 %397 }
 0x293   : > { %v404_v39 = vsub.f32 %v363_v28, %v398_v38 }
 0x294   : > { %v401_v40 = vpop.xlane.xlu0 %400 }
 0x295   : > { %v410_v41 = vmul.f32 1.442695, %v404_v39  ;;  %v405_v42 = vsub.f32 %v386_v30, %v401_v40 }
 0x297   : > { %811 = vpow2.f32 %v410_v41  ;;  %v412_v43 = vmul.f32 1.442695, %v405_v42 }
 0x299   : > { %813 = vpow2.f32 %v412_v43 }
 0x29a   : > { %v453_v44 = vpop.permute.xlu2 %452 }
 0x29b   : > { %v458_v45 = vsel %vm435_vm2, %v453_v44, 0  ;;  %v810_v44 = vld [vmem:[%s1213_s3] ss:$0 sm:$0xff] }
 0x29c   : > { %467 = vmatpush.bf16.msrb.mxu2 %v458_v45 }
 0x29d   : > { %v812_v46 = vpop.eup %811 }
 0x29e   : > { %v420_v47 = vsel %vm301_vm1, %v812_v46, 0.0  ;;  %v428_v61 = vpack.c.bf16 %v812_v46, %v812_v46 }
 0x29f   : > { %v814_v48 = vpop.eup %813  ;;  %421 = vadd.xlane.f32.xlu1 %v420_v47 }
 0x2a0   : > { %v423_v49 = vsel %vm301_vm1, %v814_v48, 0.0  ;;  %v429_v55 = vpack.c.bf16 %v814_v48, %v814_v48 }
 0x2a1   : > { %424 = vadd.xlane.f32.xlu2 %v423_v49 }
 0x2a2   : > { %v395_v50 = vpop.xlane.xlu1 %394 }
 0x2a3   : > { %v403_v51 = vsub.f32 %v340_v34, %v395_v50 }
 0x2a5   : > { %v408_v52 = vmul.f32 1.442695, %v403_v51 }
 0x2a7   : > { %815 = vpow2.f32 %v408_v52  ;;  %v495_v53 = vpop.permute.xlu0 %494 }
 0x2a8   : > { %v500_v54 = vsel %vm435_vm2, %v495_v53, 0 }
 0x2a9   : > { %509 = vmatpush.bf16.msra.mxu0 %v500_v54 }
 0x2ac   : > { %715 = vmatmul.msk.bf16.vlgmr.msra.gmra.mxu0 %vm301_vm1, %v429_v55 }
 0x2ad   : > { %v816_v56 = vpop.eup %815 }
 0x2ae   : > { %v417_v57 = vsel %vm301_vm1, %v816_v56, 0.0  ;;  %v427_v58 = vpack.c.bf16 %v816_v56, %v816_v56 }
 0x2af   : > { %418 = vadd.xlane.f32.xlu0 %v417_v57 }
 0x2b0   : > { %713 = vmatmul.msk.bf16.vlgmr.msrb.gmra.mxu2 %vm301_vm1, %v427_v58 }
 0x2ba   : > { %v474_v59 = vpop.permute.xlu1 %473 }
 0x2bb   : > { %v479_v60 = vsel %vm435_vm2, %v474_v59, 0 }
 0x2bc   : > { %488 = vmatpush.bf16.msrb.mxu3 %v479_v60 }
 0x2bf   : > { %714 = vmatmul.msk.bf16.vlgmr.msrb.gmra.mxu3 %vm301_vm1, %v428_v61 }
 0x2c2   : > { %v431_v62 = vpop.permute.xlu1 %430 }
 0x2c3   : > { %v437_v63 = vsel %vm435_vm2, %v431_v62, 0 }
 0x2c4   : > { %446 = vmatpush.bf16.msrb.mxu1 %v437_v63 }
 0x2c8   : > { %574 = vmatpush.bf16.msra.mxu1 %v732_v32 }
 0x2cc   : > { %575 = vmatpush.bf16.msra.mxu1 %v731_v33 }
 0x2d3   : > { %v392_v0 = vpop.xlane.xlu2 %391 }
 0x2d4   : > { %v402_v1 = vsub.f32 %v1149_v26, %v392_v0 }
 0x2d6   : > { %v406_v2 = vmul.f32 1.442695, %v402_v1 }
 0x2d8   : > { %817 = vpow2.f32 %v406_v2 }
 0x2de   : > { %v818_v3 = vpop.eup %817 }
 0x2df   : > { %v414_v4 = vsel %vm301_vm1, %v818_v3, 0.0  ;;  %v426_v5 = vpack.c.bf16 %v818_v3, %v818_v3 }
 0x2e0   : > { %415 = vadd.xlane.f32.xlu0 %v414_v4 }
 0x2e1   : > { %712 = vmatmul.msk.bf16.vlgmr.msrb.gmra.mxu1 %vm301_vm1, %v426_v5 }
 0x312   : > { %v422_v20 = vpop.xlane.xlu1 %421 }
 0x314   : > { %v425_v6 = vpop.xlane.xlu2 %424 }
 0x315   : > { %819 = vrcp.f32 %v425_v6 }
 0x31b   : > { %v820_v7 = vpop.eup %819 }
 0x322   : > { %v419_v9 = vpop.xlane.xlu0 %418 }
 0x323   : > { %821 = vrcp.f32 %v419_v9 }
 0x324   : > { %823 = vrcp.f32 %v422_v20 }
 0x329   : > { %v511_v8 = vpop.f32.mrf.mxu0  ;;  %v822_v15 = vpop.eup %821 }
 0x32a   : > { %v522_v10 = vmul.f32 %v820_v7, %v511_v8  ;;  %v824_v23 = vpop.eup %823 }
 0x32c   : > { %v526_v11 = vpack.c.bf16 %v522_v10, %v522_v10 }
 0x32e   : > { %v538_v12 = vunpack.c.l.b16 %v526_v11 }
 0x330   : > { %v539_v13 = vpack.c.b16 %v538_v12, %v538_v12 }
 0x331   : > { %v513_v14 = vpop.f32.mrf.mxu0 }
 0x332   : > { %540 = vrot.lane.b32.xlu0 %v539_v13, %s998_s6 }
 0x333   : > { %v469_v16 = vpop.f32.mrf.mxu2 }
 0x334   : > { %v520_v17 = vmul.f32 %v822_v15, %v469_v16 }
 0x336   : > { %v524_v18 = vpack.c.bf16 %v520_v17, %v520_v17 }
 0x338   : > { %v528_v19 = vunpack.c.l.b16 %v524_v18 }
 0x33a   : > { %v529_v21 = vpack.c.b16 %v528_v19, %v528_v19 }
 0x33b   : > { %v471_v22 = vpop.f32.mrf.mxu2 }
 0x33c   : > { %530 = vrot.lane.b32.xlu2 %v529_v21, %s999_s7 }
 0x342   : > { %v490_v24 = vpop.f32.mrf.mxu3 }
 0x343   : > { %v521_v25 = vmul.f32 %v824_v23, %v490_v24 }
 0x345   : > { %v525_v26 = vpack.c.bf16 %v521_v25, %v521_v25 }
 0x347   : > { %v533_v27 = vunpack.c.l.b16 %v525_v26 }
 0x349   : > { %v534_v28 = vpack.c.b16 %v533_v27, %v533_v27 }
 0x34a   : > { %v492_v29 = vpop.f32.mrf.mxu3 }
 0x34b   : > { %535 = vrot.lane.b32.xlu1 %v534_v28, %s1000_s9 }
 0x353   : > { %v416_v34 = vpop.xlane.xlu0 %415 }
 0x354   : > { %825 = vrcp.f32 %v416_v34 }
 0x35a   : > { %v826_v35 = vpop.eup %825 }
 0x35e   : > { %v448_v30 = vpop.f32.mrf.mxu1 }
 0x35f   : > { %v519_v36 = vmul.f32 %v826_v35, %v448_v30 }
 0x361   : > { %v523_v38 = vpack.c.bf16 %v519_v36, %v519_v36 }
 0x366   : > { %v450_v31 = vpop.f32.mrf.mxu1 }
 0x396   : > { %v531_v37 = vpop.permute.xlu2 %530 }
 0x397   : > { %v544_v39 = vsel %vm301_vm1, %v523_v38, %v531_v37 }
 0x3a4   : > { %v541_v41 = vpop.permute.xlu0 %540 }
 0x3bd   : > { %v536_v40 = vpop.permute.xlu1 %535 }
 0x3be   : > { %v547_v42 = vsel %vm545_vm3, %v544_v39, %v536_v40 }
 0x3bf   : > { %v550_v43 = vsel %vm548_vm4, %v547_v42, %v541_v41 }
 0x3c0   : > { %724 = vmatmul.msk.bf16.vlgmr.msra.gmra.mxu1 %vm272_vm0, %v550_v43 }
 0x43d   : > { %v577_v45 = vpop.f32.mrf.mxu1 }
 0x43e   : > { %v578_v46 = vadd.f32 %v810_v44, %v577_v45 }
 0x440   : > { %581 = vst.msk [vmem:[%s247_s28] sm:$0xff] %vm272_vm0, %v578_v46 }
 0x441   : > { %944 = shalt.err (!%p941_p9)
}
 0x442   : > { %743 = dma.vmem_to_hbm [thread:$0]  (%p1095_p4), %s596_s23, 128, %s598_s13, %s583_s22  }
 0x445   : > { %v579_v47 = vpop.f32.mrf.mxu1 }
 0x446 PF: > { %s609_s14 = sand.u32 1, %s975_s15   ;;  %p1221_p10 = scmp.ge.s32.totalorder %s987_s18, 2 }
 0x447   : > { %s610_s10 = scalar_lea.sflag [#allocation4], %s609_s14 }
 0x448   : > { %p757_p13 = pnand %p1221_p10, %p1099_p6 }
 0x44a   : > { %p758_p11 = pneg %p757_p13 }
 0x44c   : > { %970 = dma.done.wait (%p758_p11), %s610_s10, 128  }
 0x44d   : > { %972 = vsyncadd (%p758_p11), %s610_s10, 4294967168  ;;  %p18_p0 = scmp.ge.s32.totalorder %s1069_s8, 4   ;;  %s1222_s15 = smov %s979_s16 }
 0x44e   : > { %s1223_s16 = smov %s983_s17  ;;  %s1224_s17 = smov %s1080_s11 }
 0x44f   : > { %s1225_s18 = smov %s1069_s8  ;;  %20 = sbr.rel (!%p18_p0) target bundleno = 6 (0x6), region = 89 }
 0x454   :  { %616 = vsyncpa [#allocation3], 1 }
 0x455   :  { %618 = vsyncpa [#allocation3 + $0x1], 1 }
 0x456   :  { %619 = vsyncpa [#allocation6], 1 }
 0x457   :  { %620 = vsyncpa [#allocation4], 1 }
 0x458   :  { %622 = vsyncpa [#allocation4 + $0x1], 1 }

// kernel: tpu_custom_call.1
= control target key start
LH: loop header
LB: loop body
LE: loop exit
PB: predicated region body
PF: predicated region fallthrough
CT: control target
= control target key end

     0   :  { %9 = vsyncpa [#allocation3], 0  ;;  %s1210_s0 = inlined_call_operand.hbm [shape: f32[2,8,32], index: 0, kind: input, shape index: {}]   ;;  %s1211_s1 = inlined_call_operand.hbm [shape: bf16[32,96], index: 1, kind: input, shape index: {}]   ;;  %s1212_s2 = inlined_call_operand.hbm [shape: bf16[32,32], index: 2, kind: input, shape index: {}]   ;;  %s1213_s3 = inlined_call_operand.vmem [shape: f32[1,32], index: 3, kind: input, shape index: {}]   ;;  %s1214_s4 = inlined_call_operand.hbm [shape: f32[2,8,32], index: 4, kind: output, shape index: {}]  }
   0x1   :  { %11 = vsyncpa [#allocation3 + $0x1], 0 }
   0x2   :  { %12 = vsyncpa [#allocation6], 0 }
   0x3   :  { %13 = vsyncpa [#allocation4], 0 }
   0x4   :  { %15 = vsyncpa [#allocation4 + $0x1], 0  ;;  %s1026_s15 = smov 0   ;;  %s1028_s16 = smov 0  }
   0x5   :  { %s1030_s17 = smov 0   ;;  %s1032_s18 = smov 0  }
   0x6 LB: > { %s152_s21 = sshll.u32 %s1211_s1, 4  ;;  %s1050_s22 = sadd.s32 4294967295, %s987_s18   ;;  %s987_s18 = sphi %s1032_s18, %s1225_s18   ;;  %s983_s17 = sphi %s1030_s17, %s1224_s17   ;;  %s979_s16 = sphi %s1028_s16, %s1223_s16   ;;  %s975_s15 = sphi %s1026_s15, %s1222_s15   ;;  %s153_s21 = int_to_ptr.hbm [resolvable:$true] %s152_s21 }
   0x7   : > { %p688_p0 = scmp.ge.s32.totalorder %s987_s18, 1  ;;  %p42_p1 = scmp.eq.s32.totalorder %s1050_s22, 0 }
   0x8   : > { %p141_p2 = scmp.lt.s32.totalorder %s987_s18, 3  ;;  %s989_s24 = smov [#allocation5]  }
   0x9   : > { %s154_s25 = sshll.u32 %s989_s24, 4  ;;  %s166_s28 = sshll.u32 %s1212_s2, 4  ;;  %s155_s25 = int_to_ptr.vmem [resolvable:$true] %s154_s25  ;;  %s167_s28 = int_to_ptr.hbm [resolvable:$true] %s166_s28 }
   0xa   : > { %p1055_p3 = pnand %p688_p0, %p141_p2  ;;  %s990_s29 = smov [#allocation7]  }
   0xb   : > { %s168_s30 = sshll.u32 %s990_s29, 4  ;;  %s991_s5 = smov 64   ;;  %s169_s30 = int_to_ptr.vmem [resolvable:$true] %s168_s30 }
   0xc   : > { %p745_p4 = pneg %p1055_p3  ;;  %s992_s6 = smov 4  }
   0xd   : > { %s687_s7 = sadd.s32 4294967294, %s987_s18   ;;  %s1069_s8 = sadd.s32 1, %s987_s18  }
   0xe   : > { %p746_p6 = pnand %p745_p4, %p42_p1  ;;  %s25_s9 = ssub.s32 %s987_s18, %s1069_s8 }
   0xf   : > { %s28_s10 = sadd.s32 1, %s983_s17  ;;  %p26_p7 = scmp.eq.s32.totalorder %s25_s9, 0 }
  0x10   : > { %748 = dma.hbm_to_vmem [thread:$0]  (!%p746_p6), %s153_s21, 256, %s155_s25, [#allocation6], %s991_s5, %s991_s5, %s992_s6  }
  0x11   : > { %751 = dma.hbm_to_vmem [thread:$0]  (!%p746_p6), %s167_s28, 256, %s169_s30, [#allocation6], %s991_s5, %s991_s5, %s992_s6  }
  0x12   : > { %p35_p8 = scmp.ne.s32.totalorder %s983_s17, %s979_s16  ;;  %p36_p9 = scmp.eq.s32.totalorder %s987_s18, 0 }
  0x13   : > { %p41_p10 = scmp.ne.s32.totalorder %s979_s16, %s975_s15  ;;  %p128_p13 = scmp.eq.s32.totalorder %s1050_s22, 1 }
  0x14   : > { %s1080_s11 = scalar_select %p26_p7, %s983_s17, %s28_s10  }
  0x15   : > { %p1082_p11 = por %p36_p9, %p35_p8  ;;  %p1088_p12 = por %p42_p1, %p41_p10 }
  0x16   : > { %p134_p0 = scmp.eq.s32.totalorder %s687_s7, 1  ;;  %p762_p2 = scmp.lt.s32.totalorder %s987_s18, 2 }
  0x17   : > { %s185_s14 = sand.u32 1, %s983_s17   ;;  %p1095_p4 = por %p128_p13, %p35_p8 }
  0x18   : > { %p1099_p6 = por %p134_p0, %p41_p10  ;;  %s692_s21 = sshll.u32 %s185_s14, 3 }
  0x19   : > { %s693_s24 = sshll.u32 %s987_s18, 3  ;;  %s189_s28 = scalar_lea.vmem [#allocation2], %s692_s21 }
  0x1a   : > { %s193_s27 = scalar_lea.hbm %s1210_s0, %s693_s24  ;;  %s197_s29 = sshll.u32 %s189_s28, 4  ;;  %s198_s29 = int_to_ptr.vmem [resolvable:$true] %s197_s29 }
  0x1b   : > { %s195_s30 = sshll.u32 %s193_s27, 4  ;;  %p1109_p7 = pnand %p762_p2, %p1082_p11  ;;  %s196_s30 = int_to_ptr.hbm [resolvable:$true] %s195_s30 }
  0x1c   : > { %s186_s6 = scalar_lea.sflag [#allocation3], %s185_s14  ;;  %s887_s7 = sshra.s32 %s196_s30, 4  ;;  %s888_s7 = int_to_ptr.hbm [resolvable:$true] %s887_s7 }
  0x1d   : > { %s889_s9 = scalar_lea.hbm %s888_s7, 8  ;;  %p891_p9 = pneg %p1109_p7 }
  0x1e   : > { %p890_p8 = scmp.ne.s32.totalorder %s888_s7, %s889_s9  ;;  %s894_s24 = scalar_lea.hbm %s1210_s0, 16 }
  0x1f   : > { %p895_p11 = scmp.lt.s32.totalorder %s888_s7, %s1210_s0  ;;  %p896_p0 = scmp.lt.s32.totalorder %s894_s24, %s889_s9 }
  0x20   : > { %p892_p10 = pnand %p891_p9, %p890_p8 }
  0x21   : > { %p897_p2 = por %p896_p0, %p895_p11 }
  0x22   : > { %p893_p13 = pneg %p892_p10 }
  0x24   : > { %p898_p5 = pnand %p897_p2, %p893_p13 }
  0x26   : > { %901 = shalt.err (!%p898_p5)
}
  0x27   : > { %755 = dma.hbm_to_vmem [thread:$0]  (!%p1109_p7), %s196_s30, 128, %s198_s29, %s186_s6  }
  0x28   : > { %206 = sbr.rel (%p1055_p3) target bundleno = 1094 (0x446), region = 36  ;;  %s1126_s14 = sand.u32 (!%p1055_p3), 1, %s979_s16  }
  0x29   : > { %s695_s26 = sshll.u32 (!%p1055_p3), %s1126_s14, 3  ;;  %s209_s27 = scalar_lea.sflag (!%p1055_p3), [#allocation3], %s1126_s14 }
  0x2a   : > { %s212_s28 = scalar_lea.vmem (!%p1055_p3), [#allocation2], %s695_s26 }
  0x2d   : > { %962 = dma.done.wait (%p1088_p12), %s209_s27, 128  }
  0x2e   : > { %964 = vsyncadd (%p1088_p12), %s209_s27, 4294967168 }
  0x2f   : > { %966 = dma.done.wait (%p42_p1), [#allocation6], 512  }
  0x30   : > { %968 = vsyncadd (%p42_p1), [#allocation6], 4294966784  ;;  %v730_v0 = vld [vmem:[#allocation5 + $0x8] sm:$0xff]  ;;  %v729_v1 = vld [vmem:[#allocation5] sm:$0xff]  ;;  %vm272_vm0 = vcmask 261120   ;;  %s993_s23 = smov 104  }
  0x31   : > { %282 = vmatpush.bf16.msra.mxu0 %v730_v0  ;;  %v249_v2 = vld [vmem:[%s212_s28] sm:$0xff]  ;;  %s994_s13 = smov 120   ;;  %s995_s29 = smov 112   ;;  %vm301_vm1 = vcmask 64512   ;;  %vm435_vm2 = vcmask 1043456   ;;  %vm545_vm3 = vcmask 130048  }
  0x32   : > { %v250_v3 = vpack.c.bf16 %v249_v2, %v249_v2  ;;  %s996_s30 = smov 96   ;;  %s997_s5 = smov 64   ;;  %vm548_vm4 = vcmask 195584  }
  0x33   : > { %s998_s6 = smov 24   ;;  %s999_s7 = smov 8  }
  0x34   : > { %s1000_s9 = smov 16   ;;  %s726_s10 = sshll.u32 %s1050_s22, 3 }
  0x35   : > { %283 = vmatpush.bf16.msra.mxu0 %v729_v1  ;;  %s593_s25 = scalar_lea.hbm %s1214_s4, %s726_s10  ;;  %s247_s28 = scalar_lea.vmem [#allocation8], %s695_s26 }
  0x36   : > { %s583_s22 = scalar_lea.sflag [#allocation4], %s1126_s14  ;;  %s937_s26 = scalar_lea.hbm %s1214_s4, 16 }
  0x38   : > { %707 = vmatmul.msk.bf16.vlgmr.msra.gmra.mxu0 %vm272_vm0, %v250_v3 }
  0xb5   : > { %v285_v4 = vpop.f32.mrf.mxu0 }
  0xb6   : > { %v289_v5 = vpack.c.bf16 %v285_v4, %v285_v4 }
  0xb8   : > { %295 = vrot.lane.b32.xlu1 %v289_v5, %s993_s23  ;;  %291 = vrot.lane.b32.xlu0 %v289_v5, %s994_s13  ;;  %v297_v7 = vunpack.c.l.b16 %v289_v5  ;;  %s595_s23 = sshll.u32 %s247_s28, 4  ;;  %s597_s13 = sshll.u32 %s593_s25, 4  ;;  %s596_s23 = int_to_ptr.vmem [resolvable:$true] %s595_s23  ;;  %s598_s13 = int_to_ptr.hbm [resolvable:$true] %s597_s13 }
  0xba   : > { %v298_v8 = vpack.c.b16 %v297_v7, %v297_v7 }
  0xbd   : > { %v287_v6 = vpop.f32.mrf.mxu0 }
  0xc0   : > { %293 = vrot.lane.b32.xlu0 %v289_v5, %s995_s29  ;;  %s931_s29 = sshra.s32 %s598_s13, 4  ;;  %s932_s29 = int_to_ptr.hbm [resolvable:$true] %s931_s29 }
  0xc1   : > { %p938_p12 = scmp.lt.s32.totalorder %s932_s29, %s1214_s4 }
  0xc8   : > { %299 = vrot.lane.b32.xlu0 %v298_v8, %s996_s30 }
 0x12a   : > { %v292_v9 = vpop.permute.xlu0 %291  ;;  %v296_v15 = vpop.permute.xlu1 %295 }
 0x12b   : > { %v321_v10 = vunpack.c.l.b16 %v292_v9  ;;  %v367_v16 = vunpack.c.l.b16 %v296_v15 }
 0x12d   : > { %v322_v11 = vpack.c.b16 %v321_v10, %v321_v10  ;;  %v368_v19 = vpack.c.b16 %v367_v16, %v367_v16 }
 0x12f   : > { %323 = vrot.lane.b32.xlu1 %v322_v11, %s996_s30 }
 0x132   : > { %v294_v12 = vpop.permute.xlu0 %293 }
 0x133   : > { %v344_v13 = vunpack.c.l.b16 %v294_v12 }
 0x135   : > { %v345_v14 = vpack.c.b16 %v344_v13, %v344_v13 }
 0x137   : > { %346 = vrot.lane.b32.xlu2 %v345_v14, %s996_s30 }
 0x13a   : > { %v300_v17 = vpop.permute.xlu0 %299 }
 0x13b   : > { %v306_v18 = vsel %vm301_vm1, %v300_v17, 0 }
 0x13c   : > { %315 = vmatpush.bf16.xpose.msra.mxu1 %v306_v18 }
 0x13f   : > { %369 = vrot.lane.b32.xlu2 %v368_v19, %s996_s30  ;;  %s933_s30 = scalar_lea.hbm %s932_s29, 8 }
 0x140   : > { %p934_p1 = scmp.ne.s32.totalorder %s932_s29, %s933_s30  ;;  %p939_p7 = scmp.lt.s32.totalorder %s937_s26, %s933_s30 }
 0x142   : > { %p935_p3 = pnand %p934_p1, %p1095_p4  ;;  %p940_p8 = por %p939_p7, %p938_p12 }
 0x143   : > { %708 = vmatmul.msk.bf16.vlgmr.msra.gmra.mxu1 %vm301_vm1, %v289_v5 }
 0x144   : > { %p936_p5 = pneg %p935_p3 }
 0x146   : > { %p941_p9 = pnand %p940_p8, %p936_p5 }
 0x191   : > { %v347_v20 = vpop.permute.xlu2 %346 }
 0x192   : > { %v352_v21 = vsel %vm301_vm1, %v347_v20, 0 }
 0x193   : > { %361 = vmatpush.bf16.xpose.msra.mxu3 %v352_v21 }
 0x199   : > { %v370_v22 = vpop.permute.xlu2 %369 }
 0x19a   : > { %710 = vmatmul.msk.bf16.vlgmr.msra.gmra.mxu3 %vm301_vm1, %v294_v12  ;;  %v375_v23 = vsel %vm301_vm1, %v370_v22, 0 }
 0x19b   : > { %384 = vmatpush.bf16.xpose.msrb.mxu0 %v375_v23 }
 0x1a1   : > { %v324_v24 = vpop.permute.xlu1 %323 }
 0x1a2   : > { %711 = vmatmul.msk.bf16.vlgmr.msrb.gmra.mxu0 %vm301_vm1, %v296_v15  ;;  %v329_v25 = vsel %vm301_vm1, %v324_v24, 0 }
 0x1a3   : > { %338 = vmatpush.bf16.xpose.msra.mxu2 %v329_v25 }
 0x1aa   : > { %709 = vmatmul.msk.bf16.vlgmr.msra.gmra.mxu2 %vm301_vm1, %v292_v9 }
 0x1c0   : > { %v1149_v26 = vpop.f32.mrf.mxu1 }
 0x1c1   : > { %v390_v37 = vsel %vm301_vm1, %v1149_v26, -inf }
 0x1c8   : > { %v319_v27 = vpop.f32.mrf.mxu1 }
 0x21d   : > { %v363_v28 = vpop.f32.mrf.mxu3 }
 0x21e   : > { %v396_v29 = vsel %vm301_vm1, %v363_v28, -inf }
 0x21f   : > { %397 = vmax.xlane.f32.xlu2 %v396_v29  ;;  %v386_v30 = vpop.f32.mrf.mxu0 }
 0x220   : > { %v399_v31 = vsel %vm301_vm1, %v386_v30, -inf }
 0x221   : > { %400 = vmax.xlane.f32.xlu0 %v399_v31 }
 0x225   : > { %v365_v32 = vpop.f32.mrf.mxu3 }
 0x226   : > { %v732_v32 = vld [vmem:[#allocation7 + $0x8] sm:$0xff] }
 0x227   : > { %v388_v33 = vpop.f32.mrf.mxu0 }
 0x228   : > { %v731_v33 = vld [vmem:[#allocation7] sm:$0xff] }
 0x22d   : > { %v340_v34 = vpop.f32.mrf.mxu2 }
 0x22e   : > { %v393_v35 = vsel %vm301_vm1, %v340_v34, -inf }
 0x22f   : > { %394 = vmax.xlane.f32.xlu1 %v393_v35 }
 0x235   : > { %v342_v36 = vpop.f32.mrf.mxu2  ;;  %494 = vrot.lane.b32.xlu0 %v368_v19, %s997_s5 }
 0x237   : > { %452 = vrot.lane.b32.xlu2 %v322_v11, %s997_s5 }
 0x248   : > { %473 = vrot.lane.b32.xlu1 %v345_v14, %s997_s5 }
 0x250   : > { %430 = vrot.lane.b32.xlu1 %v298_v8, %s997_s5 }
 0x260   : > { %391 = vmax.xlane.f32.xlu2 %v390_v37 }
 0x292   : > { %v398_v38 = vpop.xlane.xlu2 %397 }
 0x293   : > { %v404_v39 = vsub.f32 %v363_v28, %v398_v38 }
 0x294   : > { %v401_v40 = vpop.xlane.xlu0 %400 }
 0x295   : > { %v410_v41 = vmul.f32 1.442695, %v404_v39  ;;  %v405_v42 = vsub.f32 %v386_v30, %v401_v40 }
 0x297   : > { %811 = vpow2.f32 %v410_v41  ;;  %v412_v43 = vmul.f32 1.442695, %v405_v42 }
 0x299   : > { %813 = vpow2.f32 %v412_v43 }
 0x29a   : > { %v453_v44 = vpop.permute.xlu2 %452 }
 0x29b   : > { %v458_v45 = vsel %vm435_vm2, %v453_v44, 0  ;;  %v810_v44 = vld [vmem:[%s1213_s3] ss:$0 sm:$0xff] }
 0x29c   : > { %467 = vmatpush.bf16.msrb.mxu2 %v458_v45 }
 0x29d   : > { %v812_v46 = vpop.eup %811 }
 0x29e   : > { %v420_v47 = vsel %vm301_vm1, %v812_v46, 0.0  ;;  %v428_v61 = vpack.c.bf16 %v812_v46, %v812_v46 }
 0x29f   : > { %v814_v48 = vpop.eup %813  ;;  %421 = vadd.xlane.f32.xlu1 %v420_v47 }
 0x2a0   : > { %v423_v49 = vsel %vm301_vm1, %v814_v48, 0.0  ;;  %v429_v55 = vpack.c.bf16 %v814_v48, %v814_v48 }
 0x2a1   : > { %424 = vadd.xlane.f32.xlu2 %v423_v49 }
 0x2a2   : > { %v395_v50 = vpop.xlane.xlu1 %394 }
 0x2a3   : > { %v403_v51 = vsub.f32 %v340_v34, %v395_v50 }
 0x2a5   : > { %v408_v52 = vmul.f32 1.442695, %v403_v51 }
 0x2a7   : > { %815 = vpow2.f32 %v408_v52  ;;  %v495_v53 = vpop.permute.xlu0 %494 }
 0x2a8   : > { %v500_v54 = vsel %vm435_vm2, %v495_v53, 0 }
 0x2a9   : > { %509 = vmatpush.bf16.msra.mxu0 %v500_v54 }
 0x2ac   : > { %715 = vmatmul.msk.bf16.vlgmr.msra.gmra.mxu0 %vm301_vm1, %v429_v55 }
 0x2ad   : > { %v816_v56 = vpop.eup %815 }
 0x2ae   : > { %v417_v57 = vsel %vm301_vm1, %v816_v56, 0.0  ;;  %v427_v58 = vpack.c.bf16 %v816_v56, %v816_v56 }
 0x2af   : > { %418 = vadd.xlane.f32.xlu0 %v417_v57 }
 0x2b0   : > { %713 = vmatmul.msk.bf16.vlgmr.msrb.gmra.mxu2 %vm301_vm1, %v427_v58 }
 0x2ba   : > { %v474_v59 = vpop.permute.xlu1 %473 }
 0x2bb   : > { %v479_v60 = vsel %vm435_vm2, %v474_v59, 0 }
 0x2bc   : > { %488 = vmatpush.bf16.msrb.mxu3 %v479_v60 }
 0x2bf   : > { %714 = vmatmul.msk.bf16.vlgmr.msrb.gmra.mxu3 %vm301_vm1, %v428_v61 }
 0x2c2   : > { %v431_v62 = vpop.permute.xlu1 %430 }
 0x2c3   : > { %v437_v63 = vsel %vm435_vm2, %v431_v62, 0 }
 0x2c4   : > { %446 = vmatpush.bf16.msrb.mxu1 %v437_v63 }
 0x2c8   : > { %574 = vmatpush.bf16.msra.mxu1 %v732_v32 }
 0x2cc   : > { %575 = vmatpush.bf16.msra.mxu1 %v731_v33 }
 0x2d3   : > { %v392_v0 = vpop.xlane.xlu2 %391 }
 0x2d4   : > { %v402_v1 = vsub.f32 %v1149_v26, %v392_v0 }
 0x2d6   : > { %v406_v2 = vmul.f32 1.442695, %v402_v1 }
 0x2d8   : > { %817 = vpow2.f32 %v406_v2 }
 0x2de   : > { %v818_v3 = vpop.eup %817 }
 0x2df   : > { %v414_v4 = vsel %vm301_vm1, %v818_v3, 0.0  ;;  %v426_v5 = vpack.c.bf16 %v818_v3, %v818_v3 }
 0x2e0   : > { %415 = vadd.xlane.f32.xlu0 %v414_v4 }
 0x2e1   : > { %712 = vmatmul.msk.bf16.vlgmr.msrb.gmra.mxu1 %vm301_vm1, %v426_v5 }
 0x312   : > { %v422_v20 = vpop.xlane.xlu1 %421 }
 0x314   : > { %v425_v6 = vpop.xlane.xlu2 %424 }
 0x315   : > { %819 = vrcp.f32 %v425_v6 }
 0x31b   : > { %v820_v7 = vpop.eup %819 }
 0x322   : > { %v419_v9 = vpop.xlane.xlu0 %418 }
 0x323   : > { %821 = vrcp.f32 %v419_v9 }
 0x324   : > { %823 = vrcp.f32 %v422_v20 }
 0x329   : > { %v511_v8 = vpop.f32.mrf.mxu0  ;;  %v822_v15 = vpop.eup %821 }
 0x32a   : > { %v522_v10 = vmul.f32 %v820_v7, %v511_v8  ;;  %v824_v23 = vpop.eup %823 }
 0x32c   : > { %v526_v11 = vpack.c.bf16 %v522_v10, %v522_v10 }
 0x32e   : > { %v538_v12 = vunpack.c.l.b16 %v526_v11 }
 0x330   : > { %v539_v13 = vpack.c.b16 %v538_v12, %v538_v12 }
 0x331   : > { %v513_v14 = vpop.f32.mrf.mxu0 }
 0x332   : > { %540 = vrot.lane.b32.xlu0 %v539_v13, %s998_s6 }
 0x333   : > { %v469_v16 = vpop.f32.mrf.mxu2 }
 0x334   : > { %v520_v17 = vmul.f32 %v822_v15, %v469_v16 }
 0x336   : > { %v524_v18 = vpack.c.bf16 %v520_v17, %v520_v17 }
 0x338   : > { %v528_v19 = vunpack.c.l.b16 %v524_v18 }
 0x33a   : > { %v529_v21 = vpack.c.b16 %v528_v19, %v528_v19 }
 0x33b   : > { %v471_v22 = vpop.f32.mrf.mxu2 }
 0x33c   : > { %530 = vrot.lane.b32.xlu2 %v529_v21, %s999_s7 }
 0x342   : > { %v490_v24 = vpop.f32.mrf.mxu3 }
 0x343   : > { %v521_v25 = vmul.f32 %v824_v23, %v490_v24 }
 0x345   : > { %v525_v26 = vpack.c.bf16 %v521_v25, %v521_v25 }
 0x347   : > { %v533_v27 = vunpack.c.l.b16 %v525_v26 }
 0x349   : > { %v534_v28 = vpack.c.b16 %v533_v27, %v533_v27 }
 0x34a   : > { %v492_v29 = vpop.f32.mrf.mxu3 }
 0x34b   : > { %535 = vrot.lane.b32.xlu1 %v534_v28, %s1000_s9 }
 0x353   : > { %v416_v34 = vpop.xlane.xlu0 %415 }
 0x354   : > { %825 = vrcp.f32 %v416_v34 }
 0x35a   : > { %v826_v35 = vpop.eup %825 }
 0x35e   : > { %v448_v30 = vpop.f32.mrf.mxu1 }
 0x35f   : > { %v519_v36 = vmul.f32 %v826_v35, %v448_v30 }
 0x361   : > { %v523_v38 = vpack.c.bf16 %v519_v36, %v519_v36 }
 0x366   : > { %v450_v31 = vpop.f32.mrf.mxu1 }
 0x396   : > { %v531_v37 = vpop.permute.xlu2 %530 }
 0x397   : > { %v544_v39 = vsel %vm301_vm1, %v523_v38, %v531_v37 }
 0x3a4   : > { %v541_v41 = vpop.permute.xlu0 %540 }
 0x3bd   : > { %v536_v40 = vpop.permute.xlu1 %535 }
 0x3be   : > { %v547_v42 = vsel %vm545_vm3, %v544_v39, %v536_v40 }
 0x3bf   : > { %v550_v43 = vsel %vm548_vm4, %v547_v42, %v541_v41 }
 0x3c0   : > { %724 = vmatmul.msk.bf16.vlgmr.msra.gmra.mxu1 %vm272_vm0, %v550_v43 }
 0x43d   : > { %v577_v45 = vpop.f32.mrf.mxu1 }
 0x43e   : > { %v578_v46 = vadd.f32 %v810_v44, %v577_v45 }
 0x440   : > { %581 = vst.msk [vmem:[%s247_s28] sm:$0xff] %vm272_vm0, %v578_v46 }
 0x441   : > { %944 = shalt.err (!%p941_p9)
}
 0x442   : > { %743 = dma.vmem_to_hbm [thread:$0]  (%p1095_p4), %s596_s23, 128, %s598_s13, %s583_s22  }
 0x445   : > { %v579_v47 = vpop.f32.mrf.mxu1 }
 0x446 PF: > { %s609_s14 = sand.u32 1, %s975_s15   ;;  %p1221_p10 = scmp.ge.s32.totalorder %s987_s18, 2 }
 0x447   : > { %s610_s10 = scalar_lea.sflag [#allocation4], %s609_s14 }
 0x448   : > { %p757_p13 = pnand %p1221_p10, %p1099_p6 }
 0x44a   : > { %p758_p11 = pneg %p757_p13 }
 0x44c   : > { %970 = dma.done.wait (%p758_p11), %s610_s10, 128  }
 0x44d   : > { %972 = vsyncadd (%p758_p11), %s610_s10, 4294967168  ;;  %p18_p0 = scmp.ge.s32.totalorder %s1069_s8, 4   ;;  %s1222_s15 = smov %s979_s16 }
 0x44e   : > { %s1223_s16 = smov %s983_s17  ;;  %s1224_s17 = smov %s1080_s11 }
 0x44f   : > { %s1225_s18 = smov %s1069_s8  ;;  %20 = sbr.rel (!%p18_p0) target bundleno = 6 (0x6), region = 89 }
 0x454   :  { %616 = vsyncpa [#allocation3], 1 }
 0x455   :  { %618 = vsyncpa [#allocation3 + $0x1], 1 }
 0x456   :  { %619 = vsyncpa [#allocation6], 1 }
 0x457   :  { %620 = vsyncpa [#allocation4], 1 }
 0x458   :  { %622 = vsyncpa [#allocation4 + $0x1], 1 }

</bundles_post_ra>
